<compile_context>
chip_gen: v7x
topology: tpu7x:2x2x1
jax: 0.10.0
libtpu: 0.0.40
codegen_flags: <defaults>
</compile_context>

<pallas_src>
import math
import functools

import jax
import jax.numpy as jnp
from jax.experimental import pallas as pl
from jax.experimental.pallas import tpu as pltpu


def _cdiv(a, b):
    return -(-a // b)


def _round_up(a, m):
    return _cdiv(a, m) * m


def sinusoidal_kernel(x_ref, tab_ref, out_ref, *, k: int):
    """x_ref: (TB, k) f32; tab_ref: (2, dim) f32; out_ref: (TB, k*dim)."""
    freq = tab_ref[0:1, :]          # (1, dim) frequencies (tiled twice over dim)
    off = tab_ref[1:2, :]           # (1, dim): 0 for sin half, pi/2 for cos half
    # Expand the k packed positions into a full-lane (TB, k*dim) phase tile.
    # Per-piece broadcast mul/add is 2 VALU ops; the lane concat is XLU work;
    # the dominant cost (the sin polynomial) then runs on dense 128-lane vregs.
    phase = jnp.concatenate(
        [x_ref[:, j:j + 1] * freq + off for j in range(k)], axis=-1)
    out_ref[...] = jnp.sin(phase).astype(out_ref.dtype)


@functools.partial(jax.jit, static_argnames=("dim", "block_b", "out_dtype"))
def sinusoidal_embedding(x, dim, *, block_b=1024, out_dtype=jnp.float32):
    """Pallas equivalent of SinusoidalEmbedding(dim)(x) for a 1-D x of positions."""
    assert x.ndim == 1, "expects a 1-D tensor of positions, like the torch module"
    assert dim % 2 == 0, "dim must be even (concat of sin/cos halves)"
    B = x.shape[0]
    half = dim // 2

    # Hoisted tables (computed once in the wrapper, tiny resident VMEM input).
    scale = math.log(10000.0) / half
    freqs = jnp.exp(jnp.arange(half, dtype=jnp.float32) * -scale)        # (half,)
    freq_row = jnp.concatenate([freqs, freqs])                           # (dim,)
    off_row = jnp.concatenate([jnp.zeros((half,), jnp.float32),
                               jnp.full((half,), jnp.pi / 2.0, jnp.float32)])
    tab = jnp.stack([freq_row, off_row], axis=0)                         # (2, dim)

    # Lane-packing factor: k positions per output row so rows are >= 128 lanes.
    k = max(1, 128 // dim)
    W = k * dim

    bp_raw = _cdiv(B, k)                          # packed rows before padding
    itemsize = jnp.dtype(out_dtype).itemsize

    # Block rows from a VMEM budget: double-buffered output block <= 8 MiB
    # (within v5e's 16 MiB scoped default; ample headroom on v6e/v7x).
    tb_budget = max(8, (8 * 1024 * 1024) // (2 * W * itemsize) // 8 * 8)
    # Cap so the grid has >= 2 steps when possible (both v7x TensorCores busy).
    tb_split = _round_up(_cdiv(bp_raw, 2), 8)
    TB = min(block_b, tb_budget, tb_split)
    if TB >= bp_raw:
        TB = bp_raw                               # single full-extent block
    else:
        TB = max(8, (TB // 8) * 8)                # sublane-aligned tile

    bp = _round_up(bp_raw, TB)                    # padded packed rows
    b_pad = bp * k

    xp = jnp.pad(x.astype(jnp.float32), (0, b_pad - B))
    x2d = xp.reshape(bp, k)

    grid = (bp // TB,)
    cost = pl.CostEstimate(
        flops=2 * bp * W,                         # mul + add per output element
        transcendentals=bp * W,                   # one sin per output element
        bytes_accessed=b_pad * 4 + 2 * dim * 4 + bp * W * itemsize,
    )

    out_packed = pl.pallas_call(
        functools.partial(sinusoidal_kernel, k=k),
        out_shape=jax.ShapeDtypeStruct((bp, W), out_dtype),
        grid=grid,
        in_specs=[
            pl.BlockSpec((TB, k), lambda i: (i, 0)),      # packed positions
            pl.BlockSpec((2, dim), lambda i: (0, 0)),     # freq/offset table, resident
        ],
        out_specs=pl.BlockSpec((TB, W), lambda i: (i, 0)),
        compiler_params=pltpu.CompilerParams(
            dimension_semantics=("parallel",),            # shards over both TCs on v7x
        ),
        cost_estimate=cost,
    )(x2d, tab)

    # Packed (bp, k*dim) rows are row-major identical to (b_pad, dim).
    return out_packed.reshape(b_pad, dim)[:B]


def _reference(x, dim):
    """Pure-JAX reference mirroring the torch forward exactly."""
    half_dim = dim // 2
    emb = math.log(10000.0) / half_dim
    emb = jnp.exp(jnp.arange(half_dim, dtype=jnp.float32) * -emb)
    emb = x.astype(jnp.float32)[:, None] * emb[None, :]
    return jnp.concatenate([jnp.sin(emb), jnp.cos(emb)], axis=-1)


if __name__ == "__main__":
    key = jax.random.PRNGKey(0)
    k0, k1, k2 = jax.random.split(key, 3)

    # 1) Module-consistent small shapes: a batch of 64 timesteps, dim=32.
    #    Exercises the lane-packed path (k=4 positions per 128-lane row, 2 grid steps).
    B, DIM = 64, 32
    x = jax.random.uniform(k0, (B,), jnp.float32, minval=0.0, maxval=1000.0)
    out = jax.block_until_ready(sinusoidal_embedding(x, DIM))
    ref = _reference(x, DIM)
    assert out.shape == (B, DIM) and out.dtype == jnp.float32
    # atol covers the f32 rounding of the +pi/2 phase-offset trick (~|t| * 2^-24).
    assert jnp.allclose(out, ref, atol=2e-4, rtol=0.0), "mismatch vs reference (packed)"

    # 2) Ragged batch size (exercises zero-padding + multi-step grid).
    B2 = 50
    x2 = jax.random.uniform(k1, (B2,), jnp.float32, minval=0.0, maxval=1000.0)
    out2 = jax.block_until_ready(sinusoidal_embedding(x2, DIM))
    assert out2.shape == (B2, DIM)
    assert jnp.allclose(out2, _reference(x2, DIM), atol=2e-4, rtol=0.0), "mismatch (ragged)"

    # 3) dim >= 128 (unpacked k=1 path, already lane-dense).
    B3, DIM3 = 64, 256
    x3 = jax.random.uniform(k2, (B3,), jnp.float32, minval=0.0, maxval=1000.0)
    out3 = jax.block_until_ready(sinusoidal_embedding(x3, DIM3))
    assert out3.shape == (B3, DIM3)
    assert jnp.allclose(out3, _reference(x3, DIM3), atol=2e-4, rtol=0.0), "mismatch (k=1)"

    print("KERNEL_OK")
</pallas_src>

<mosaic_0001>
module attributes {stable_mosaic.version = 11 : i64} {
  func.func @sinusoidal_kernel(%arg0: i32, %arg1: memref<8x4xf32, #tpu.memory_space<vmem>>, %arg2: memref<2x32xf32, #tpu.memory_space<vmem>>, %arg3: memref<8x128xf32, #tpu.memory_space<vmem>>) attributes {dimension_semantics = [#tpu.dimension_semantics<parallel>], iteration_bounds = array<i64: 2>, scalar_prefetch = 0 : i64, scratch_operands = 0 : i64, tpu.core_type = #tpu.core_type<tc>, window_params = [{transform_indices = @transform_0, window_bounds = array<i64: 8, 4>}, {pipeline_mode = #tpu.pipeline_mode<synchronous>, transform_indices = @transform_1, window_bounds = array<i64: 2, 32>}, {transform_indices = @transform_2, window_bounds = array<i64: 8, 128>}]} {
    %c0 = arith.constant 0 : index
    %c0_0 = arith.constant 0 : index
    %0 = vector.load %arg2[%c0, %c0_0] : memref<2x32xf32, #tpu.memory_space<vmem>>, vector<1x32xf32>
    %c1 = arith.constant 1 : index
    %c0_1 = arith.constant 0 : index
    %1 = vector.load %arg2[%c1, %c0_1] : memref<2x32xf32, #tpu.memory_space<vmem>>, vector<1x32xf32>
    %c0_2 = arith.constant 0 : index
    %c0_3 = arith.constant 0 : index
    %2 = vector.load %arg1[%c0_2, %c0_3] : memref<8x4xf32, #tpu.memory_space<vmem>>, vector<8x1xf32>
    %3 = vector.broadcast %2 : vector<8x1xf32> to vector<8x32xf32>
    %4 = vector.broadcast %0 : vector<1x32xf32> to vector<8x32xf32>
    %5 = arith.mulf %3, %4 : vector<8x32xf32>
    %6 = vector.broadcast %1 : vector<1x32xf32> to vector<8x32xf32>
    %7 = arith.addf %5, %6 : vector<8x32xf32>
    %c0_4 = arith.constant 0 : index
    %c1_5 = arith.constant 1 : index
    %8 = vector.load %arg1[%c0_4, %c1_5] : memref<8x4xf32, #tpu.memory_space<vmem>>, vector<8x1xf32>
    %9 = vector.broadcast %8 : vector<8x1xf32> to vector<8x32xf32>
    %10 = vector.broadcast %0 : vector<1x32xf32> to vector<8x32xf32>
    %11 = arith.mulf %9, %10 : vector<8x32xf32>
    %12 = vector.broadcast %1 : vector<1x32xf32> to vector<8x32xf32>
    %13 = arith.addf %11, %12 : vector<8x32xf32>
    %c0_6 = arith.constant 0 : index
    %c2 = arith.constant 2 : index
    %14 = vector.load %arg1[%c0_6, %c2] : memref<8x4xf32, #tpu.memory_space<vmem>>, vector<8x1xf32>
    %15 = vector.broadcast %14 : vector<8x1xf32> to vector<8x32xf32>
    %16 = vector.broadcast %0 : vector<1x32xf32> to vector<8x32xf32>
    %17 = arith.mulf %15, %16 : vector<8x32xf32>
    %18 = vector.broadcast %1 : vector<1x32xf32> to vector<8x32xf32>
    %19 = arith.addf %17, %18 : vector<8x32xf32>
    %c0_7 = arith.constant 0 : index
    %c3 = arith.constant 3 : index
    %20 = vector.load %arg1[%c0_7, %c3] : memref<8x4xf32, #tpu.memory_space<vmem>>, vector<8x1xf32>
    %21 = vector.broadcast %20 : vector<8x1xf32> to vector<8x32xf32>
    %22 = vector.broadcast %0 : vector<1x32xf32> to vector<8x32xf32>
    %23 = arith.mulf %21, %22 : vector<8x32xf32>
    %24 = vector.broadcast %1 : vector<1x32xf32> to vector<8x32xf32>
    %25 = arith.addf %23, %24 : vector<8x32xf32>
    %26 = tpu.concatenate %7, %13, %19, %25 in 1 : vector<8x32xf32>, vector<8x32xf32>, vector<8x32xf32>, vector<8x32xf32> -> vector<8x128xf32>
    %27 = math.sin %26 : vector<8x128xf32>
    %c0_8 = arith.constant 0 : index
    %c0_9 = arith.constant 0 : index
    %28 = vector.load %arg3[%c0_8, %c0_9] : memref<8x128xf32, #tpu.memory_space<vmem>>, vector<8x128xf32>
    tpu.vector_store %arg3[%c0_8, %c0_9], %27 {strides = array<i32>} : memref<8x128xf32, #tpu.memory_space<vmem>>, vector<8x128xf32>,
    return
  }
  func.func @transform_0(%arg0: i32) -> (i32, i32) {
    %c0_i32 = arith.constant 0 : i32
    %c0_i32_0 = arith.constant 0 : i32
    return %arg0, %c0_i32 : i32, i32
  }
  func.func @transform_1(%arg0: i32) -> (i32, i32) {
    %c0_i32 = arith.constant 0 : i32
    %c0_i32_0 = arith.constant 0 : i32
    %c0_i32_1 = arith.constant 0 : i32
    return %c0_i32, %c0_i32_0 : i32, i32
  }
  func.func @transform_2(%arg0: i32) -> (i32, i32) {
    %c0_i32 = arith.constant 0 : i32
    %c0_i32_0 = arith.constant 0 : i32
    return %arg0, %c0_i32 : i32, i32
  }
}

</mosaic_0001>

<bundles_post_ra>
// kernel: sinusoidal_embedding.1
= control target key start
LH: loop header
LB: loop body
LE: loop exit
PB: predicated region body
PF: predicated region fallthrough
CT: control target
= control target key end

     0   :  { %s436_s9 = smov 0   ;;  %s487_s0 = inlined_call_operand.vmem [shape: f32[16,4], index: 0, kind: input, shape index: {}]   ;;  %s488_s1 = inlined_call_operand.vmem [shape: f32[2,32], index: 1, kind: input, shape index: {}]   ;;  %s489_s2 = inlined_call_operand.vmem [shape: f32[16,128], index: 2, kind: output, shape index: {}]  }
   0x1 LB: > { %s351_s10 = sadd.s32 4294967295, %s406_s9   ;;  %p355_p0 = scmp.ge.s32.totalorder %s406_s9, 1  ;;  %s406_s9 = sphi %s436_s9, %s12_s9  }
   0x2   : > { %p111_p1 = scmp.lt.s32.totalorder %s406_s9, 3 }
   0x4   : > { %p112_p2 = pnand %p355_p0, %p111_p1 }
   0x5   : > { %p131_p3 = scmp.lt.s32.totalorder (!%p112_p2), %s351_s10, 1  ;;  %v408_v0 = vmov (!%p112_p2), 1   ;;  %v409_v1 = vmov (!%p112_p2), 3   ;;  %v410_v3 = vmov (!%p112_p2), 2   ;;  %v411_v4 = vmov (!%p112_p2), 0   ;;  %s412_s19 = smov (!%p112_p2), 32  }
   0x6   : > { %115 = sbr.rel (%p112_p2) target bundleno = 351 (0x15f), region = 28  ;;  %391 = vset.pattern.permute.xlu0 (!%p112_p2), %v408_v0  ;;  %393 = vset.pattern.permute.xlu1 (!%p112_p2), %v409_v1  ;;  %v358_v5 = vld [vmem:[%s488_s1] ss:$0 sm:$0xff] (!%p112_p2)  ;;  %v359_v6 = vld [vmem:[%s488_s1 + $0x1] ss:$0 sm:$0xff] (!%p112_p2)  ;;  %s413_s20 = smov (!%p112_p2), 96  }
   0x7   : > { %s414_s21 = smov (!%p112_p2), 64   ;;  %vm187_vm0 = vcmask (!%p112_p2), 261120   ;;  %vm189_vm1 = vcmask (!%p112_p2), 523264   ;;  %vm191_vm2 = vcmask (!%p112_p2), 785408   ;;  %v415_v35 = vmov (!%p112_p2), 683565275  }
   0x8   : > { %v416_v37 = vmov (!%p112_p2), 2475754826   ;;  %v417_v40 = vmov (!%p112_p2), 2131351028   ;;  %v418_v43 = vmov (!%p112_p2), 2102212464  }
   0x9   : > { %v419_v46 = vmov (!%p112_p2), 920167782   ;;  %v420_v49 = vmov (!%p112_p2), 1326507024  }
   0xd   : > { %s491_s10 = smov (!%p131_p3, %s351_s10), 1 }
   0xe   : > { %s356_s11 = sshll.u32 %s491_s10, 3 }
   0xf   : > { %s134_s14 = scalar_lea.vmem %s487_s0, %s356_s11  ;;  %s138_s24 = scalar_lea.vmem %s489_s2, %s356_s11 }
  0x10   : > { %v141_v2 = vld [vmem:[%s134_s14] sm:$0xff] }
  0x11   : > { %158 = vperm.xlu0 %391, %v141_v2   ;;  %170 = vperm.xlu1 %393, %v141_v2  }
  0x15   : > { %392 = vset.pattern.permute.xlu0 %v410_v3  ;;  %394 = vset.pattern.permute.xlu1 %v411_v4 }
  0x16   : > { %164 = vperm.xlu0 %392, %v141_v2   ;;  %144 = vperm.xlu1 %394, %v141_v2  }
  0x1a   : > { %395 = vset.pattern.permute.xlu0 %v409_v1 }
  0x90   : > { %v159_v7 = vpop.permute.xlu0 %158  ;;  %v171_v8 = vpop.permute.xlu1 %170 }
  0x91   : > { %v161_v9 = vmul.f32 %v358_v5, %v159_v7  ;;  %v173_v10 = vmul.f32 %v358_v5, %v171_v8 }
  0x93   : > { %v162_v11 = vadd.f32 %v359_v6, %v161_v9  ;;  %v174_v13 = vadd.f32 %v359_v6, %v173_v10 }
  0x95   : > { %176 = vrot.lane.b32.xlu1 %v162_v11, %s412_s19  ;;  %v165_v12 = vpop.permute.xlu0 %164  ;;  %v145_v14 = vpop.permute.xlu1 %144 }
  0x96   : > { %v167_v15 = vmul.f32 %v358_v5, %v165_v12  ;;  %v151_v16 = vmul.f32 %v358_v5, %v145_v14 }
  0x98   : > { %v168_v17 = vadd.f32 %v359_v6, %v167_v15  ;;  %v156_v18 = vadd.f32 %v359_v6, %v151_v16 }
  0x99   : > { %184 = vrot.lane.b32.xlu1 %v174_v13, %s413_s20 }
  0x9a   : > { %180 = vrot.lane.b32.xlu0 %v168_v17, %s414_s21 }
 0x107   : > { %v177_v19 = vpop.permute.xlu1 %176 }
 0x108   : > { %v188_v21 = vsel %vm187_vm0, %v156_v18, %v177_v19 }
 0x10b   : > { %v185_v20 = vpop.permute.xlu1 %184 }
 0x10c   : > { %v181_v22 = vpop.permute.xlu0 %180 }
 0x10d   : > { %v190_v23 = vsel %vm189_vm1, %v188_v21, %v181_v22 }
 0x10e   : > { %v458_v24 = vsel %vm191_vm2, %v190_v23, %v185_v20 }
 0x10f   : > { %v196_v25 = vand.u32 2139095040, %v458_v24  ;;  %v193_v29 = vand.u32 2147483647, %v458_v24  ;;  %vm195_vm10 = vcmp.lt.s32.totalorder %v458_v24, 0  ;;  %vm285_vm15 = vweird.f32 %v458_v24 }
 0x111   : > { %v197_v26 = vshrl.u32 %v196_v25, 23  ;;  %v200_v32 = vand.u32 8388607, %v193_v29  ;;  %vm194_vm11 = vcmp.le.f32.partialorder %v193_v29, 0.7853982 }
 0x113   : > { %v360_v27 = vadd.s32 4294967169, %v197_v26  ;;  %v201_v51 = vor.u32 8388608, %v200_v32 }
 0x115   : > { %v203_v28 = vadd.s32 1, %v360_v27  ;;  %v241_v1 = vshll.u32 %v201_v51, 8 }
 0x117   : > { %vm204_vm3 = vcmp.gt.s32.totalorder %v203_v28, 0 }
 0x118   : > { %v205_v30 = vsel %vm204_vm3, %v203_v28, 0 }
 0x119   : > { %v207_v31 = vand.u32 31, %v205_v30  ;;  %v206_v34 = vshrl.u32 %v205_v30, 5 }
 0x11b   : > { %v208_v33 = vsub.s32 32, %v207_v31  ;;  %v210_v36 = vshll.u32 %v415_v35, %v207_v31  ;;  %v213_v38 = vshll.u32 %v416_v37, %v207_v31  ;;  %v216_v42 = vshll.u32 %v417_v40, %v207_v31 }
 0x11c   : > { %v219_v45 = vshll.u32 %v418_v43, %v207_v31  ;;  %v222_v48 = vshll.u32 %v419_v46, %v207_v31  ;;  %vm225_vm4 = vcmp.lt.s32.totalorder %v206_v34, 1  ;;  %vm228_vm5 = vcmp.lt.s32.totalorder %v206_v34, 4 }
 0x11d   : > { %v211_v39 = vshrl.u32 %v416_v37, %v208_v33  ;;  %v214_v41 = vshrl.u32 %v417_v40, %v208_v33  ;;  %v217_v44 = vshrl.u32 %v418_v43, %v208_v33  ;;  %v220_v47 = vshrl.u32 %v419_v46, %v208_v33 }
 0x11e   : > { %v223_v50 = vshrl.u32 %v420_v49, %v208_v33  ;;  %v209_v60 = vshrl.u32 %v415_v35, %v208_v33  ;;  %vm227_vm6 = vcmp.lt.s32.totalorder %v206_v34, 3  ;;  %vm226_vm7 = vcmp.lt.s32.totalorder %v206_v34, 2 }
 0x11f   : > { %v212_v52 = vor.u32 %v211_v39, %v210_v36  ;;  %v215_v53 = vor.u32 %v214_v41, %v213_v38  ;;  %v218_v54 = vor.u32 %v217_v44, %v216_v42  ;;  %v221_v55 = vor.u32 %v220_v47, %v219_v45 }
 0x120   : > { %v224_v56 = vor.u32 %v223_v50, %v222_v48 }
 0x121   : > { %v230_v57 = vsel %vm228_vm5, %v218_v54, 2102212464  ;;  %v233_v58 = vsel %vm225_vm4, %v212_v52, %v215_v53  ;;  %v237_v59 = vsel %vm225_vm4, %v215_v53, %v218_v54  ;;  %v234_v61 = vsel %vm228_vm5, %v221_v55, 920167782 }
 0x122   : > { %v238_v62 = vsel %vm228_vm5, %v224_v56, 1326507024  ;;  %v235_v63 = vsel %vm227_vm6, %v218_v54, %v234_v61  ;;  %v229_v2 = vsel %vm225_vm4, %v209_v60, %v212_v52  ;;  %v231_v3 = vsel %vm227_vm6, %v215_v53, %v230_v57 }
 0x123   : > { %v239_v0 = vsel %vm227_vm6, %v221_v55, %v238_v62  ;;  %v236_v4 = vsel %vm226_vm7, %v233_v58, %v235_v63  ;;  %v232_v10 = vsel %vm226_vm7, %v229_v2, %v231_v3 }
 0x124   : > { %v240_v5 = vsel %vm226_vm7, %v237_v59, %v239_v0  ;;  %v467_v8 = vmul.u32.u64.low %v241_v1, %v236_v4  ;;  %v468_v9 = vmul.u32.u64.high %v241_v1, %v236_v4, %v467_v8  ;;  %v248_v12 = vmul.u32 %v241_v1, %v232_v10 }
 0x125   : > { %v464_v6 = vmul.u32.u64.low %v241_v1, %v240_v5  ;;  %v465_v7 = vmul.u32.u64.high %v241_v1, %v240_v5, %v464_v6 }
 0x126   : > { %v251_v11 = vadd.s32 1, %v468_v9 }
 0x127   : > { %vm250_vm8 = vc.u32 %v465_v7, %v467_v8  ;;  %v249_v25 = vadd.s32 %v467_v8, %v465_v7 }
 0x128   : > { %v252_v13 = vsel %vm250_vm8, %v251_v11, %v468_v9 }
 0x129   : > { %v253_v14 = vadd.s32 %v252_v13, %v248_v12 }
 0x12b   : > { %v254_v15 = vadd.s32 536870912, %v253_v14 }
 0x12d   : > { %v255_v16 = vshrl.u32 %v254_v15, 30 }
 0x12f   : > { %v256_v17 = vshll.u32 %v255_v16, 30  ;;  %v279_v38 = vsub.s32 4, %v255_v16 }
 0x131   : > { %v257_v18 = vsub.s32 %v253_v14, %v256_v17  ;;  %v280_v41 = vsel %vm195_vm10, %v279_v38, %v255_v16 }
 0x132   : > { %v282_v43 = vsel %vm194_vm11, 0, %v280_v41 }
 0x133   : > { %v259_v19 = vsub.s32 0, %v257_v18  ;;  %v286_v44 = vadd.s32 3, %v282_v43 }
 0x135   : > { %v361_v20 = vmin.u32 %v259_v19, %v257_v18  ;;  %v287_v45 = vand.u32 3, %v286_v44 }
 0x137   : > { %v261_v21 = vclz %v361_v20  ;;  %vm292_vm12 = vcmp.eq.s32.totalorder %v287_v45, 2  ;;  %vm289_vm13 = vcmp.eq.s32.totalorder %v287_v45, 0  ;;  %vm288_vm14 = vcmp.lt.s32.totalorder %v287_v45, 2 }
 0x139   : > { %v362_v22 = vadd.s32 4294967294, %v261_v21 }
 0x13b   : > { %vm363_vm9 = vcmp.lt.s32.totalorder %v362_v22, 0 }
 0x13c   : > { %v264_v23 = vsel %vm363_vm9, 0, %v362_v22 }
 0x13d   : > { %v265_v26 = vsub.s32 32, %v264_v23  ;;  %v269_v27 = vsub.s32 4294967266, %v264_v23  ;;  %v266_v28 = vshll.u32 %v257_v18, %v264_v23 }
 0x13f   : > { %v267_v30 = vshrl.u32 %v249_v25, %v265_v26  ;;  %v270_v31 = vadd.s32 127, %v269_v27 }
 0x141   : > { %v268_v32 = vor.u32 %v267_v30, %v266_v28  ;;  %v271_v33 = vshll.u32 %v270_v31, 23 }
 0x143   : > { %v272_v34 = vor.u32 4788187, %v271_v33  ;;  %v275_v36 = vcvt.s32.f32 %v268_v32 }
 0x145   : > { %v273_v35 = vand.u32 2147483647, %v272_v34 }
 0x147   : > { %v276_v37 = vmul.f32 %v275_v36, %v273_v35 }
 0x149   : > { %v277_v39 = vxor.u32 2147483648, %v276_v37 }
 0x14b   : > { %v278_v40 = vsel %vm195_vm10, %v277_v39, %v276_v37 }
 0x14c   : > { %v281_v42 = vsel %vm194_vm11, %v458_v24, %v278_v40 }
 0x14d   : > { %396 = vcosq.f32 %v281_v42 }
 0x14e   : > { %398 = vsinq.f32 %v281_v42 }
 0x157   : > { %v397_v46 = vpop.eup %396 }
 0x158   : > { %v399_v47 = vpop.eup %398  ;;  %v293_v48 = vxor.u32 2147483648, %v397_v46 }
 0x159   : > { %v290_v49 = vxor.u32 2147483648, %v399_v47 }
 0x15a   : > { %v294_v50 = vsel %vm292_vm12, %v293_v48, %v399_v47 }
 0x15b   : > { %v291_v29 = vsel %vm289_vm13, %v397_v46, %v290_v49 }
 0x15c   : > { %v295_v51 = vsel %vm288_vm14, %v291_v29, %v294_v50 }
 0x15d   : > { %v296_v52 = vsel %vm285_vm15, nan, %v295_v51 }
 0x15e   : > { %297 = vst [vmem:[%s138_s24] sm:$0xff] %v296_v52 }
 0x15f PF: > { %s12_s9 = sadd.s32 1, %s406_s9  }
 0x160   : > { %p9_p4 = scmp.ge.s32.totalorder %s12_s9, 4  }
 0x162   :  { %11 = sbr.rel (!%p9_p4) target bundleno = 1 (0x1), region = 58 }

</bundles_post_ra>
